<compile_context>
chip_gen: v5e
topology: v5e:2x2
jax: 0.10.0
libtpu: 0.0.40
codegen_flags: <defaults>
</compile_context>

<pallas_src>
import jax
import jax.numpy as jnp
from jax.experimental import pallas as pl
from jax.experimental.pallas import tpu as pltpu


def _round_up(x, m):
    return (x + m - 1) // m * m


def _default_vmem_limit_bytes():
    """Scoped-VMEM budget.

    Per-TensorCore physical VMEM is 128 MiB on v5e/v6e and 64 MiB on v7x;
    get_tpu_info() may report chip-level capacity (2 TCs/chip on v7x), so clamp
    to 64 MiB before taking ~7/8 headroom.  This kernel's footprint at ViT-class
    shapes (< ~30 MiB) sits well under 56 MiB, so the clamp costs nothing on
    v5e/v6e while keeping the plan valid on v7x.
    """
    try:
        cap = int(pltpu.get_tpu_info().vmem_capacity_bytes)
    except Exception:
        return 48 << 20  # conservative: fits under every generation's VMEM
    return min(cap, 64 << 20) * 7 // 8


def _estimate_vmem_bytes(tm, C, H, O, th, x_bytes, out_bytes, cd_bytes):
    """Conservative VMEM estimate for one grid step (used to size the row tile).

    Weights are counted double-buffered on purpose: if the single-buffer request
    (pl.Buffered(1)) is not honored, the tiling plan is still valid.
    """
    weights = 2 * (C * H * cd_bytes + H * 4 + H * O * cd_bytes + O * 4)
    io = 2 * tm * C * x_bytes + 2 * tm * O * out_bytes      # double-buffered tiles
    live = tm * C * cd_bytes                                 # cast x tile
    live += tm * th * (4 + cd_bytes)                         # per-chunk hidden (f32 + cast)
    live += tm * O * 4                                       # f32 output accumulator
    return weights + io + live


def _const_spec(block_shape):
    """Grid-invariant operand (constant index_map -> fetched once).

    Request a single VMEM buffer where supported; the fallback is intentionally
    narrow (only 'pipeline_mode / Buffered not available in this jax version')
    so genuine lowering errors are never masked.  Falling back only costs VMEM,
    which the tile-size estimate already budgets for.
    """
    index_map = lambda i: (0, 0)
    try:
        return pl.BlockSpec(block_shape, index_map, pipeline_mode=pl.Buffered(1))
    except (AttributeError, TypeError, ValueError):
        return pl.BlockSpec(block_shape, index_map)


def _make_mlp_kernel(th, n_chunks, compute_dtype, gelu_approximate):
    def kernel(x_ref, w1_ref, b1_ref, w2_ref, b2_ref, o_ref):
        # Per-tile cast of the activations (VPU work hidden under the MXU);
        # x stays in its original dtype in HBM so the wrapper does no extra pass.
        x = x_ref[...].astype(compute_dtype)
        acc = jnp.zeros(o_ref.shape, jnp.float32)
        # Hidden dimension in static chunks; intentionally unrolled straight-line
        # code so the scheduler can overlap chunk j's bias+GELU (VALU/EUP) with
        # chunk j+1's MXU work, while the live intermediate is only (tm, th).
        for j in range(n_chunks):
            lo = j * th
            w1c = w1_ref[:, lo:lo + th]
            b1c = b1_ref[:, lo:lo + th]
            w2c = w2_ref[lo:lo + th, :]
            # fc1 chunk: (tm, C) @ (C, th) on the MXU, f32 accumulation.
            h = jnp.dot(x, w1c, preferred_element_type=jnp.float32)
            h = h + b1c  # bias added in f32
            # tanh-approx GELU routes the transcendental to the EUP slot
            # (otherwise idle next to the MXU); exact erf is available for
            # parity with torch.nn.GELU() at ~1e-3 numeric delta.
            h = jax.nn.gelu(h, approximate=gelu_approximate)
            h = h.astype(compute_dtype)
            # fc2 chunk: (tm, th) @ (th, O), accumulated in f32.
            acc = acc + jnp.dot(h, w2c, preferred_element_type=jnp.float32)
        o_ref[...] = (acc + b2_ref[...]).astype(o_ref.dtype)
        # Dropout(p=0.0) is the identity and is omitted.
    return kernel


def mlp_forward(x, w1, b1, w2, b2, *, tile_rows=512, hidden_chunk=512,
                compute_dtype=jnp.bfloat16, gelu_approximate=True,
                vmem_limit_bytes=None):
    """DeiT Mlp forward: gelu(x @ w1 + b1) @ w2 + b2, dropout(p=0) omitted.

    x: (B, N, C); w1: (C, H); b1: (H,); w2: (H, O); b2: (O,).
    Output dtype matches x.dtype.  Matmuls use `compute_dtype` operands with f32
    accumulation; GELU uses the tanh approximation by default (EUP-friendly).
    Set compute_dtype=jnp.float32, gelu_approximate=False for torch-exact
    numerics.
    """
    B, N, C = x.shape
    H = w1.shape[1]
    O = w2.shape[1]
    assert w1.shape == (C, H) and b1.shape == (H,)
    assert w2.shape == (H, O) and b2.shape == (O,)
    rows = B * N
    out_dtype = x.dtype

    if vmem_limit_bytes is None:
        vmem_limit_bytes = _default_vmem_limit_bytes()

    # Hidden-dim chunk: honor a user-provided divisor of H (multiple of 8),
    # otherwise pick a 128-multiple divisor (lane/sublane-aligned slices of the
    # resident weights), otherwise process H whole.
    th = H
    if hidden_chunk and 0 < hidden_chunk < H and H % hidden_chunk == 0 \
            and hidden_chunk % 8 == 0:
        th = hidden_chunk
    else:
        for cand in (1024, 512, 256, 128):
            if cand < H and H % cand == 0:
                th = cand
                break
    n_chunks = H // th

    # Row tile: large (default 512) to amortize the ~0.35us per-grid-step
    # overhead and keep the MXU fed; rounded to the MXU-native 128 rows so small
    # inputs fill the systolic array via the pad path; shrunk by halving only if
    # the conservative VMEM estimate exceeds the budget.
    x_bytes = jnp.dtype(x.dtype).itemsize
    out_bytes = jnp.dtype(out_dtype).itemsize
    cd_bytes = jnp.dtype(compute_dtype).itemsize
    tm = min(_round_up(tile_rows, 128), _round_up(rows, 128))
    while tm > 128 and _estimate_vmem_bytes(
            tm, C, H, O, th, x_bytes, out_bytes, cd_bytes) > vmem_limit_bytes:
        tm = max(128, (tm // 2) // 128 * 128)

    rows_p = _round_up(rows, tm)
    x2d = x.reshape(rows, C)
    if rows_p != rows:
        # Pad only the ragged last tile; padded rows are computed then dropped
        # (zero rows -> finite outputs, no NaN risk).
        x2d = jnp.pad(x2d, ((0, rows_p - rows), (0, 0)))

    # Weights in the MXU operand dtype (bf16 on the fast path); biases in f32 so
    # the bias-add lands on the f32 accumulator.  x is NOT pre-cast here.
    w1c = w1.astype(compute_dtype)
    w2c = w2.astype(compute_dtype)
    b1_2d = b1.reshape(1, H).astype(jnp.float32)
    b2_2d = b2.reshape(1, O).astype(jnp.float32)

    # TODO(synk): for layers whose compute-dtype weights alone approach the
    # per-TC VMEM budget (e.g. C>=2048 with 4x expansion on v7x's 64 MiB),
    # stream w1-column / w2-row blocks from HBM (pltpu.emit_pipeline) instead of
    # keeping whole matrices resident; the in-kernel H-chunk loop above already
    # has the matching structure.

    kernel = _make_mlp_kernel(th, n_chunks, compute_dtype, gelu_approximate)

    out2d = pl.pallas_call(
        kernel,
        out_shape=jax.ShapeDtypeStruct((rows_p, O), out_dtype),
        grid_spec=pltpu.PrefetchScalarGridSpec(
            num_scalar_prefetch=0,
            grid=(rows_p // tm,),
            in_specs=[
                pl.BlockSpec((tm, C), lambda i: (i, 0)),  # x row tile (orig dtype)
                _const_spec((C, H)),                      # w1, whole & resident
                _const_spec((1, H)),                      # b1
                _const_spec((H, O)),                      # w2, whole & resident
                _const_spec((1, O)),                      # b2
            ],
            # Lane-dense whenever O is a multiple of 128 (all real ViT dims);
            # the toy O=16 still works because the block spans the full dim.
            out_specs=pl.BlockSpec((tm, O), lambda i: (i, 0)),
        ),
        compiler_params=pltpu.CompilerParams(
            # Row tiles are independent -> shard across TensorCores (2 on v7x).
            dimension_semantics=("parallel",),
            vmem_limit_bytes=vmem_limit_bytes,
        ),
    )(x2d, w1c, b1_2d, w2c, b2_2d)

    if rows_p != rows:
        out2d = out2d[:rows]
    return out2d.reshape(B, N, O)


if __name__ == "__main__":
    # Small shapes consistent with the module: (B, N, C) tokens, C -> H -> O.
    B, N = 2, 8
    in_features, hidden_features, out_features = 16, 32, 16

    key = jax.random.PRNGKey(0)
    kx, kw1, kb1, kw2, kb2, kw3, kb3 = jax.random.split(key, 7)

    x = jax.random.normal(kx, (B, N, in_features), dtype=jnp.float32)
    w1 = jax.random.normal(kw1, (in_features, hidden_features), jnp.float32) * 0.05
    b1 = jax.random.normal(kb1, (hidden_features,), jnp.float32) * 0.05
    w2 = jax.random.normal(kw2, (hidden_features, out_features), jnp.float32) * 0.05
    b2 = jax.random.normal(kb2, (out_features,), jnp.float32) * 0.05

    # Pure-JAX references of the same forward semantics.
    ref_erf = jax.nn.gelu(x @ w1 + b1, approximate=False) @ w2 + b2
    ref_tanh = jax.nn.gelu(x @ w1 + b1, approximate=True) @ w2 + b2

    # 1) Fast default path: bf16 MXU operands, tanh GELU (EUP), f32 accumulation.
    out_fast = mlp_forward(x, w1, b1, w2, b2)
    jax.block_until_ready(out_fast)
    assert out_fast.shape == (B, N, out_features)
    assert out_fast.dtype == x.dtype
    assert jnp.allclose(out_fast, ref_tanh, atol=3e-2, rtol=3e-2), \
        float(jnp.max(jnp.abs(out_fast - ref_tanh)))

    # 2) Precision path: f32 operands, exact-erf GELU (torch.nn.GELU default).
    out_f32 = mlp_forward(x, w1, b1, w2, b2, compute_dtype=jnp.float32,
                          gelu_approximate=False)
    jax.block_until_ready(out_f32)
    assert jnp.allclose(out_f32, ref_erf, atol=1e-5, rtol=1e-5), \
        float(jnp.max(jnp.abs(out_f32 - ref_erf)))

    # 3) Ragged row count -> exercises the padded last-tile path.
    xr = jax.random.normal(kx, (B, N + 1, in_features), dtype=jnp.float32)
    refr = jax.nn.gelu(xr @ w1 + b1, approximate=False) @ w2 + b2
    outr = mlp_forward(xr, w1, b1, w2, b2, compute_dtype=jnp.float32,
                       gelu_approximate=False)
    jax.block_until_ready(outr)
    assert outr.shape == (B, N + 1, out_features)
    assert jnp.allclose(outr, refr, atol=1e-5, rtol=1e-5)

    # 4) Multi-chunk hidden loop (n_chunks=2) with lane-aligned 128-wide chunks.
    hidden_big = 256
    w1b = jax.random.normal(kw3, (in_features, hidden_big), jnp.float32) * 0.05
    b1b = jax.random.normal(kb3, (hidden_big,), jnp.float32) * 0.05
    w2b = jax.random.normal(kw2, (hidden_big, out_features), jnp.float32) * 0.05
    refb = jax.nn.gelu(x @ w1b + b1b, approximate=False) @ w2b + b2
    outb = mlp_forward(x, w1b, b1b, w2b, b2, hidden_chunk=128,
                       compute_dtype=jnp.float32, gelu_approximate=False)
    jax.block_until_ready(outb)
    assert outb.shape == (B, N, out_features)
    assert jnp.allclose(outb, refb, atol=1e-5, rtol=1e-5), \
        float(jnp.max(jnp.abs(outb - refb)))

    print("KERNEL_OK")
</pallas_src>

<mosaic_0001>
module attributes {stable_mosaic.version = 11 : i64} {
  func.func @kernel(%arg0: i32, %arg1: memref<128x16xf32, #tpu.memory_space<vmem>>, %arg2: memref<16x32xbf16, #tpu.memory_space<vmem>>, %arg3: memref<1x32xf32, #tpu.memory_space<vmem>>, %arg4: memref<32x16xbf16, #tpu.memory_space<vmem>>, %arg5: memref<1x16xf32, #tpu.memory_space<vmem>>, %arg6: memref<128x16xf32, #tpu.memory_space<vmem>>) attributes {dimension_semantics = [#tpu.dimension_semantics<parallel>], iteration_bounds = array<i64: 1>, scalar_prefetch = 0 : i64, scratch_operands = 0 : i64, tpu.core_type = #tpu.core_type<tc>, window_params = [{transform_indices = @transform_0, window_bounds = array<i64: 128, 16>}, {pipeline_mode = #tpu.pipeline_mode<synchronous>, transform_indices = @transform_1, window_bounds = array<i64: 16, 32>}, {pipeline_mode = #tpu.pipeline_mode<synchronous>, transform_indices = @transform_2, window_bounds = array<i64: 1, 32>}, {pipeline_mode = #tpu.pipeline_mode<synchronous>, transform_indices = @transform_3, window_bounds = array<i64: 32, 16>}, {pipeline_mode = #tpu.pipeline_mode<synchronous>, transform_indices = @transform_4, window_bounds = array<i64: 1, 16>}, {transform_indices = @transform_5, window_bounds = array<i64: 128, 16>}]} {
    %c0 = arith.constant 0 : index
    %c0_0 = arith.constant 0 : index
    %0 = vector.load %arg1[%c0, %c0_0] : memref<128x16xf32, #tpu.memory_space<vmem>>, vector<128x16xf32>
    %1 = arith.truncf %0 : vector<128x16xf32> to vector<128x16xbf16>
    %cst = arith.constant 0.000000e+00 : f32
    %2 = vector.broadcast %cst : f32 to vector<128x16xf32>
    %c0_1 = arith.constant 0 : index
    %c0_2 = arith.constant 0 : index
    %3 = vector.load %arg2[%c0_1, %c0_2] : memref<16x32xbf16, #tpu.memory_space<vmem>>, vector<16x32xbf16>
    %c0_3 = arith.constant 0 : index
    %c0_4 = arith.constant 0 : index
    %4 = vector.load %arg3[%c0_3, %c0_4] : memref<1x32xf32, #tpu.memory_space<vmem>>, vector<1x32xf32>
    %c0_5 = arith.constant 0 : index
    %c0_6 = arith.constant 0 : index
    %5 = vector.load %arg4[%c0_5, %c0_6] : memref<32x16xbf16, #tpu.memory_space<vmem>>, vector<32x16xbf16>
    %cst_7 = arith.constant dense<0.000000e+00> : vector<128x32xf32>
    %6 = tpu.matmul %1, %3, %cst_7 {dimension_numbers = #tpu.dot_dimension_numbers<[1], [0], [0], [1], [0, 0, 1, 1], [], []>} : vector<128x16xbf16>, vector<16x32xbf16>, vector<128x32xf32> -> vector<128x32xf32>
    %7 = vector.broadcast %4 : vector<1x32xf32> to vector<128x32xf32>
    %8 = arith.addf %6, %7 : vector<128x32xf32>
    %9 = arith.mulf %8, %8 : vector<128x32xf32>
    %10 = arith.mulf %8, %9 : vector<128x32xf32>
    %cst_8 = arith.constant 4.471500e-02 : f32
    %11 = vector.broadcast %cst_8 : f32 to vector<128x32xf32>
    %12 = arith.mulf %11, %10 : vector<128x32xf32>
    %13 = arith.addf %8, %12 : vector<128x32xf32>
    %cst_9 = arith.constant 0.797884583 : f32
    %14 = vector.broadcast %cst_9 : f32 to vector<128x32xf32>
    %15 = arith.mulf %14, %13 : vector<128x32xf32>
    %16 = math.tanh %15 : vector<128x32xf32>
    %cst_10 = arith.constant 1.000000e+00 : f32
    %17 = vector.broadcast %cst_10 : f32 to vector<128x32xf32>
    %18 = arith.addf %17, %16 : vector<128x32xf32>
    %cst_11 = arith.constant 5.000000e-01 : f32
    %19 = vector.broadcast %cst_11 : f32 to vector<128x32xf32>
    %20 = arith.mulf %19, %18 : vector<128x32xf32>
    %21 = arith.mulf %8, %20 : vector<128x32xf32>
    %22 = arith.truncf %21 : vector<128x32xf32> to vector<128x32xbf16>
    %cst_12 = arith.constant dense<0.000000e+00> : vector<128x16xf32>
    %23 = tpu.matmul %22, %5, %cst_12 {dimension_numbers = #tpu.dot_dimension_numbers<[1], [0], [0], [1], [0, 0, 1, 1], [], []>} : vector<128x32xbf16>, vector<32x16xbf16>, vector<128x16xf32> -> vector<128x16xf32>
    %24 = arith.addf %2, %23 : vector<128x16xf32>
    %c0_13 = arith.constant 0 : index
    %c0_14 = arith.constant 0 : index
    %25 = vector.load %arg5[%c0_13, %c0_14] : memref<1x16xf32, #tpu.memory_space<vmem>>, vector<1x16xf32>
    %26 = vector.broadcast %25 : vector<1x16xf32> to vector<128x16xf32>
    %27 = arith.addf %24, %26 : vector<128x16xf32>
    %c0_15 = arith.constant 0 : index
    %c0_16 = arith.constant 0 : index
    %28 = vector.load %arg6[%c0_15, %c0_16] : memref<128x16xf32, #tpu.memory_space<vmem>>, vector<128x16xf32>
    tpu.vector_store %arg6[%c0_15, %c0_16], %27 {strides = array<i32>} : memref<128x16xf32, #tpu.memory_space<vmem>>, vector<128x16xf32>,
    return
  }
  func.func @transform_0(%arg0: i32) -> (i32, i32) {
    %c0_i32 = arith.constant 0 : i32
    %c0_i32_0 = arith.constant 0 : i32
    return %arg0, %c0_i32 : i32, i32
  }
  func.func @transform_1(%arg0: i32) -> (i32, i32) {
    %c0_i32 = arith.constant 0 : i32
    %c0_i32_0 = arith.constant 0 : i32
    %c0_i32_1 = arith.constant 0 : i32
    return %c0_i32, %c0_i32_0 : i32, i32
  }
  func.func @transform_2(%arg0: i32) -> (i32, i32) {
    %c0_i32 = arith.constant 0 : i32
    %c0_i32_0 = arith.constant 0 : i32
    %c0_i32_1 = arith.constant 0 : i32
    return %c0_i32, %c0_i32_0 : i32, i32
  }
  func.func @transform_3(%arg0: i32) -> (i32, i32) {
    %c0_i32 = arith.constant 0 : i32
    %c0_i32_0 = arith.constant 0 : i32
    %c0_i32_1 = arith.constant 0 : i32
    return %c0_i32, %c0_i32_0 : i32, i32
  }
  func.func @transform_4(%arg0: i32) -> (i32, i32) {
    %c0_i32 = arith.constant 0 : i32
    %c0_i32_0 = arith.constant 0 : i32
    %c0_i32_1 = arith.constant 0 : i32
    return %c0_i32, %c0_i32_0 : i32, i32
  }
  func.func @transform_5(%arg0: i32) -> (i32, i32) {
    %c0_i32 = arith.constant 0 : i32
    %c0_i32_0 = arith.constant 0 : i32
    return %arg0, %c0_i32 : i32, i32
  }
}

</mosaic_0001>

<bundles_post_ra>
// kernel: tpu_custom_call.1
= control target key start
LH: loop header
LB: loop body
LE: loop exit
PB: predicated region body
PF: predicated region fallthrough
CT: control target
= control target key end

     0   :  { %vm61_vm0 = vcmask 130048   ;;  %vm303_vm1 = vcmask 261120   ;;  %s677_s1 = inlined_call_operand.vmem [shape: bf16[16,32], index: 1, kind: input, shape index: {}]   ;;  %s678_s0 = inlined_call_operand.vmem [shape: f32[128,16], index: 0, kind: input, shape index: {}]   ;;  %s679_s2 = inlined_call_operand.vmem [shape: f32[1,32], index: 2, kind: input, shape index: {}]   ;;  %s680_s3 = inlined_call_operand.vmem [shape: bf16[32,16], index: 3, kind: input, shape index: {}]   ;;  %s681_s4 = inlined_call_operand.vmem [shape: f32[1,16], index: 4, kind: input, shape index: {}]   ;;  %s682_s5 = inlined_call_operand.vmem [shape: f32[128,16], index: 5, kind: output, shape index: {}]  }
   0x1   :  { %v425_v0 = vld [vmem:[%s677_s1] sm:$0xff]  ;;  %v22_v2 = vld [vmem:[%s678_s0 + $0x8] sm:$0xff]  ;;  %v31_v4 = vld [vmem:[%s678_s0 + $0x50] sm:$0xff] }
   0x2   :  { %v21_v1 = vld [vmem:[%s678_s0] sm:$0xff]  ;;  %93 = vmatpush.bf16.msra.mxu0 %v425_v0  ;;  %428 = vmatpush.bf16.msra.mxu3 %v425_v0  ;;  %v32_v5 = vld [vmem:[%s678_s0 + $0x58] sm:$0xff]  ;;  %v23_v7 = vld [vmem:[%s678_s0 + $0x10] sm:$0xff] }
   0x3   :  { %v37_v3 = vpack.c.bf16 %v22_v2, %v21_v1  ;;  %v42_v6 = vpack.c.bf16 %v32_v5, %v31_v4  ;;  %v24_v8 = vld [vmem:[%s678_s0 + $0x18] sm:$0xff]  ;;  %v33_v10 = vld [vmem:[%s678_s0 + $0x60] sm:$0xff]  ;;  %v34_v11 = vld [vmem:[%s678_s0 + $0x68] sm:$0xff] }
   0x4   :  { %v38_v9 = vpack.c.bf16 %v24_v8, %v23_v7  ;;  %v43_v12 = vpack.c.bf16 %v34_v11, %v33_v10  ;;  %v25_v13 = vld [vmem:[%s678_s0 + $0x20] sm:$0xff]  ;;  %v26_v14 = vld [vmem:[%s678_s0 + $0x28] sm:$0xff]  ;;  %v35_v16 = vld [vmem:[%s678_s0 + $0x70] sm:$0xff] }
   0x5   :  { %401 = vmatmul.msk.bf16.vlgmr.msra.gmra.mxu0 %vm61_vm0, %v37_v3  ;;  %406 = vmatmul.msk.bf16.vlgmr.msra.gmra.mxu3 %vm61_vm0, %v42_v6  ;;  %v39_v15 = vpack.c.bf16 %v26_v14, %v25_v13  ;;  %v36_v17 = vld [vmem:[%s678_s0 + $0x78] sm:$0xff]  ;;  %v27_v19 = vld [vmem:[%s678_s0 + $0x30] sm:$0xff]  ;;  %v29_v22 = vld [vmem:[%s678_s0 + $0x40] sm:$0xff] }
   0x6   :  { %v44_v18 = vpack.c.bf16 %v36_v17, %v35_v16  ;;  %v28_v20 = vld [vmem:[%s678_s0 + $0x38] sm:$0xff]  ;;  %v30_v23 = vld [vmem:[%s678_s0 + $0x48] sm:$0xff]  ;;  %v560_v26 = vld [vmem:[%s679_s2] ss:$0 sm:$0xff] }
   0x7   :  { %v40_v21 = vpack.c.bf16 %v28_v20, %v27_v19  ;;  %v41_v24 = vpack.c.bf16 %v30_v23, %v29_v22  ;;  %v427_v25 = vld [vmem:[%s680_s3 + $0x8] sm:$0xff]  ;;  %v426_v27 = vld [vmem:[%s680_s3] sm:$0xff] }
   0x8   :  { %334 = vmatpush.bf16.msra.mxu1 %v427_v25  ;;  %429 = vmatpush.bf16.msra.mxu2 %v427_v25 }
   0xc   :  { %335 = vmatpush.bf16.msra.mxu1 %v426_v27  ;;  %430 = vmatpush.bf16.msra.mxu2 %v426_v27 }
  0x15   :  { %402 = vmatmul.msk.bf16.gmra.mxu0 %vm61_vm0, %v38_v9  ;;  %407 = vmatmul.msk.bf16.gmra.mxu3 %vm61_vm0, %v43_v12 }
  0x25   :  { %403 = vmatmul.msk.bf16.gmra.mxu0 %vm61_vm0, %v39_v15  ;;  %408 = vmatmul.msk.bf16.gmra.mxu3 %vm61_vm0, %v44_v18 }
  0x35   :  { %404 = vmatmul.msk.bf16.gmra.mxu0 %vm61_vm0, %v40_v21 }
  0x45   :  { %405 = vmatmul.msk.bf16.gmra.mxu0 %vm61_vm0, %v41_v24 }
  0x82   :  { %v95_v28 = vpop.f32.mrf.mxu0 }
  0x83   :  { %v96_v29 = vadd.f32 %v560_v26, %v95_v28 }
  0x85   :  { %v135_v30 = vmul.f32 %v96_v29, %v96_v29 }
  0x87   :  { %v151_v31 = vmul.f32 %v135_v30, %v96_v29 }
  0x88   :  { %v120_v20 = vpop.f32.mrf.mxu3 }
  0x89   :  { %v167_v32 = vmul.f32 0.044715, %v151_v31 }
  0x8a   :  { %v97_v33 = vpop.f32.mrf.mxu0 }
  0x8b   :  { %v183_v34 = vadd.f32 %v167_v32, %v96_v29  ;;  %v98_v35 = vadd.f32 %v560_v26, %v97_v33 }
  0x8d   :  { %v199_v36 = vmul.f32 0.7978846, %v183_v34  ;;  %v136_v37 = vmul.f32 %v98_v35, %v98_v35 }
  0x8f   :  { %v152_v38 = vmul.f32 %v136_v37, %v98_v35  ;;  %433 = vtanh.f32 %v199_v36 }
  0x90   :  { %v122_v36 = vpop.f32.mrf.mxu3 }
  0x91   :  { %v168_v39 = vmul.f32 0.044715, %v152_v38 }
  0x92   :  { %v100_v40 = vpop.f32.mrf.mxu0 }
  0x93   :  { %v184_v41 = vadd.f32 %v168_v39, %v98_v35  ;;  %v101_v42 = vadd.f32 %v560_v26, %v100_v40 }
  0x95   :  { %v200_v43 = vmul.f32 0.7978846, %v184_v41  ;;  %v137_v44 = vmul.f32 %v101_v42, %v101_v42  ;;  %v434_v45 = vpop.eup %433 }
  0x96   :  { %v231_v49 = vadd.f32 1.0, %v434_v45 }
  0x97   :  { %435 = vtanh.f32 %v200_v43  ;;  %v153_v46 = vmul.f32 %v137_v44, %v101_v42 }
  0x98   :  { %v247_v56 = vmul.f32 0.5, %v231_v49 }
  0x99   :  { %v169_v47 = vmul.f32 0.044715, %v153_v46 }
  0x9a   :  { %v102_v48 = vpop.f32.mrf.mxu0  ;;  %v263_v61 = vmul.f32 %v247_v56, %v96_v29  ;;  %v581_v56 = vadd.f32 %v560_v26, %v122_v36 }
  0x9b   :  { %v185_v50 = vadd.f32 %v169_v47, %v101_v42  ;;  %v103_v51 = vadd.f32 %v560_v26, %v102_v48 }
  0x9d   :  { %v436_v52 = vpop.eup %435  ;;  %v201_v53 = vmul.f32 0.7978846, %v185_v50  ;;  %v138_v54 = vmul.f32 %v103_v51, %v103_v51 }
  0x9e   :  { %v232_v55 = vadd.f32 1.0, %v436_v52 }
  0x9f   :  { %v154_v57 = vmul.f32 %v138_v54, %v103_v51  ;;  %437 = vtanh.f32 %v201_v53  ;;  %v577_v53 = vadd.f32 %v560_v26, %v120_v20  ;;  %v125_v54 = vpop.f32.mrf.mxu3 }
  0xa0   :  { %v248_v58 = vmul.f32 0.5, %v232_v55  ;;  %v592_v20 = vadd.f32 %v560_v26, %v125_v54 }
  0xa1   :  { %v170_v59 = vmul.f32 0.044715, %v154_v57 }
  0xa2   :  { %v105_v60 = vpop.f32.mrf.mxu0  ;;  %v264_v62 = vmul.f32 %v248_v58, %v98_v35 }
  0xa3   :  { %v186_v63 = vadd.f32 %v170_v59, %v103_v51  ;;  %v106_v0 = vadd.f32 %v560_v26, %v105_v60  ;;  %v145_v59 = vmul.f32 %v577_v53, %v577_v53 }
  0xa4   :  { %v279_v1 = vpack.c.bf16 %v264_v62, %v263_v61  ;;  %v146_v62 = vmul.f32 %v581_v56, %v581_v56 }
  0xa5   :  { %v202_v2 = vmul.f32 0.7978846, %v186_v63  ;;  %v139_v3 = vmul.f32 %v106_v0, %v106_v0  ;;  %v438_v4 = vpop.eup %437 }
  0xa6   :  { %417 = vmatmul.msk.bf16.vlgmr.msra.gmra.mxu1 %vm303_vm1, %v279_v1  ;;  %v233_v8 = vadd.f32 1.0, %v438_v4  ;;  %v161_v4 = vmul.f32 %v145_v59, %v577_v53 }
  0xa7   :  { %439 = vtanh.f32 %v202_v2  ;;  %v155_v5 = vmul.f32 %v139_v3, %v106_v0 }
  0xa8   :  { %v249_v15 = vmul.f32 0.5, %v233_v8 }
  0xa9   :  { %v171_v6 = vmul.f32 0.044715, %v155_v5 }
  0xaa   :  { %v107_v7 = vpop.f32.mrf.mxu0  ;;  %v265_v21 = vmul.f32 %v249_v15, %v101_v42 }
  0xab   :  { %v187_v9 = vadd.f32 %v171_v6, %v106_v0  ;;  %v108_v10 = vadd.f32 %v560_v26, %v107_v7  ;;  %v162_v7 = vmul.f32 %v146_v62, %v581_v56 }
  0xad   :  { %v440_v11 = vpop.eup %439  ;;  %v203_v12 = vmul.f32 0.7978846, %v187_v9  ;;  %v140_v13 = vmul.f32 %v108_v10, %v108_v10  ;;  %v127_v9 = vpop.f32.mrf.mxu3  ;;  %v178_v15 = vmul.f32 0.044715, %v162_v7 }
  0xae   :  { %v234_v14 = vadd.f32 1.0, %v440_v11 }
  0xaf   :  { %v156_v16 = vmul.f32 %v140_v13, %v108_v10  ;;  %441 = vtanh.f32 %v203_v12  ;;  %v177_v12 = vmul.f32 0.044715, %v161_v4 }
  0xb0   :  { %v250_v17 = vmul.f32 0.5, %v234_v14 }
  0xb1   :  { %v172_v18 = vmul.f32 0.044715, %v156_v16 }
  0xb2   :  { %v110_v19 = vpop.f32.mrf.mxu0  ;;  %v266_v22 = vmul.f32 %v250_v17, %v103_v51 }
  0xb3   :  { %v188_v23 = vadd.f32 %v172_v18, %v108_v10  ;;  %v111_v24 = vadd.f32 %v560_v26, %v110_v19  ;;  %v193_v19 = vadd.f32 %v177_v12, %v577_v53 }
  0xb4   :  { %v280_v25 = vpack.c.bf16 %v266_v22, %v265_v21  ;;  %v194_v22 = vadd.f32 %v178_v15, %v581_v56 }
  0xb5   :  { %v204_v27 = vmul.f32 0.7978846, %v188_v23  ;;  %v141_v28 = vmul.f32 %v111_v24, %v111_v24  ;;  %v442_v29 = vpop.eup %441  ;;  %v128_v23 = vadd.f32 %v560_v26, %v127_v9 }
  0xb6   :  { %418 = vmatmul.msk.bf16.gmra.mxu1 %vm303_vm1, %v280_v25  ;;  %v235_v33 = vadd.f32 1.0, %v442_v29  ;;  %v209_v25 = vmul.f32 0.7978846, %v193_v19  ;;  %v210_v29 = vmul.f32 0.7978846, %v194_v22 }
  0xb7   :  { %443 = vtanh.f32 %v204_v27  ;;  %v157_v30 = vmul.f32 %v141_v28, %v111_v24  ;;  %v130_v27 = vpop.f32.mrf.mxu3  ;;  %v432_v22 = vld [vmem:[%s681_s4] ss:$0 sm:$0xff] }
  0xb8   :  { %v251_v41 = vmul.f32 0.5, %v235_v33 }
  0xb9   :  { %v173_v31 = vmul.f32 0.044715, %v157_v30  ;;  %v148_v30 = vmul.f32 %v128_v23, %v128_v23 }
  0xba   :  { %v112_v32 = vpop.f32.mrf.mxu0  ;;  %v267_v46 = vmul.f32 %v251_v41, %v106_v0 }
  0xbb   :  { %v189_v34 = vadd.f32 %v173_v31, %v111_v24  ;;  %v113_v35 = vadd.f32 %v560_v26, %v112_v32 }
  0xbd   :  { %v444_v37 = vpop.eup %443  ;;  %v205_v38 = vmul.f32 0.7978846, %v189_v34  ;;  %v142_v39 = vmul.f32 %v113_v35, %v113_v35 }
  0xbe   :  { %v236_v40 = vadd.f32 1.0, %v444_v37 }
  0xbf   :  { %v158_v42 = vmul.f32 %v142_v39, %v113_v35  ;;  %445 = vtanh.f32 %v205_v38 }
  0xc0   :  { %v252_v43 = vmul.f32 0.5, %v236_v40 }
  0xc1   :  { %v174_v44 = vmul.f32 0.044715, %v158_v42  ;;  %v132_v42 = vpop.f32.mrf.mxu3 }
  0xc2   :  { %v115_v45 = vpop.f32.mrf.mxu0  ;;  %v268_v47 = vmul.f32 %v252_v43, %v108_v10 }
  0xc3   :  { %v190_v48 = vadd.f32 %v174_v44, %v113_v35  ;;  %v116_v49 = vadd.f32 %v560_v26, %v115_v45 }
  0xc4   :  { %v281_v50 = vpack.c.bf16 %v268_v47, %v267_v46  ;;  %v131_v46 = vadd.f32 %v560_v26, %v130_v27 }
  0xc5   :  { %v206_v51 = vmul.f32 0.7978846, %v190_v48  ;;  %v143_v52 = vmul.f32 %v116_v49, %v116_v49  ;;  %v446_v55 = vpop.eup %445  ;;  %v133_v48 = vadd.f32 %v560_v26, %v132_v42 }
  0xc6   :  { %419 = vmatmul.msk.bf16.gmra.mxu1 %vm303_vm1, %v281_v50  ;;  %v237_v61 = vadd.f32 1.0, %v446_v55  ;;  %v149_v54 = vmul.f32 %v131_v46, %v131_v46 }
  0xc7   :  { %447 = vtanh.f32 %v206_v51  ;;  %v159_v57 = vmul.f32 %v143_v52, %v116_v49  ;;  %v150_v55 = vmul.f32 %v133_v48, %v133_v48 }
  0xc8   :  { %v253_v6 = vmul.f32 0.5, %v237_v61  ;;  %v165_v59 = vmul.f32 %v149_v54, %v131_v46 }
  0xc9   :  { %v175_v58 = vmul.f32 0.044715, %v159_v57 }
  0xca   :  { %v117_v60 = vpop.f32.mrf.mxu0  ;;  %v269_v13 = vmul.f32 %v253_v6, %v111_v24  ;;  %v147_v24 = vmul.f32 %v592_v20, %v592_v20 }
  0xcb   :  { %v191_v63 = vadd.f32 %v175_v58, %v116_v49  ;;  %v118_v0 = vadd.f32 %v560_v26, %v117_v60  ;;  %v166_v60 = vmul.f32 %v150_v55, %v133_v48 }
  0xcc   :  { %v163_v32 = vmul.f32 %v147_v24, %v592_v20 }
  0xcd   :  { %v448_v1 = vpop.eup %447  ;;  %v207_v2 = vmul.f32 0.7978846, %v191_v63  ;;  %v144_v3 = vmul.f32 %v118_v0, %v118_v0  ;;  %v181_v63 = vmul.f32 0.044715, %v165_v59 }
  0xce   :  { %v238_v5 = vadd.f32 1.0, %v448_v1  ;;  %v179_v37 = vmul.f32 0.044715, %v163_v32 }
  0xcf   :  { %v160_v8 = vmul.f32 %v144_v3, %v118_v0  ;;  %449 = vtanh.f32 %v207_v2  ;;  %v197_v3 = vadd.f32 %v181_v63, %v131_v46 }
  0xd0   :  { %v254_v10 = vmul.f32 0.5, %v238_v5  ;;  %v195_v45 = vadd.f32 %v179_v37, %v592_v20 }
  0xd1   :  { %v176_v11 = vmul.f32 0.044715, %v160_v8  ;;  %v213_v7 = vmul.f32 0.7978846, %v197_v3 }
  0xd2   :  { %v270_v14 = vmul.f32 %v254_v10, %v113_v35  ;;  %v164_v35 = vmul.f32 %v148_v30, %v128_v23  ;;  %v211_v52 = vmul.f32 0.7978846, %v195_v45 }
  0xd3   :  { %v192_v16 = vadd.f32 %v176_v11, %v118_v0 }
  0xd4   :  { %v282_v17 = vpack.c.bf16 %v270_v14, %v269_v13  ;;  %v180_v40 = vmul.f32 0.044715, %v164_v35 }
  0xd5   :  { %v208_v18 = vmul.f32 0.7978846, %v192_v16  ;;  %v450_v21 = vpop.eup %449 }
  0xd6   :  { %420 = vmatmul.msk.bf16.gmra.mxu1 %vm303_vm1, %v282_v17  ;;  %v239_v28 = vadd.f32 1.0, %v450_v21  ;;  %v196_v47 = vadd.f32 %v180_v40, %v128_v23 }
  0xd7   :  { %451 = vtanh.f32 %v208_v18 }
  0xd8   :  { %453 = vtanh.f32 %v209_v25  ;;  %v255_v34 = vmul.f32 0.5, %v239_v28 }
  0xd9   :  { %455 = vtanh.f32 %v210_v29 }
  0xda   :  { %v271_v38 = vmul.f32 %v255_v34, %v116_v49  ;;  %v212_v49 = vmul.f32 0.7978846, %v196_v47  ;;  %457 = vtanh.f32 %v211_v52 }
  0xdc   :  { %459 = vtanh.f32 %v212_v49 }
  0xdd   :  { %v452_v31 = vpop.eup %451  ;;  %461 = vtanh.f32 %v213_v7 }
  0xde   :  { %v240_v33 = vadd.f32 1.0, %v452_v31  ;;  %v454_v41 = vpop.eup %453 }
  0xdf   :  { %v456_v44 = vpop.eup %455  ;;  %v241_v50 = vadd.f32 1.0, %v454_v41 }
  0xe0   :  { %v256_v36 = vmul.f32 0.5, %v240_v33  ;;  %v242_v51 = vadd.f32 1.0, %v456_v44  ;;  %v458_v1 = vpop.eup %457 }
  0xe1   :  { %v257_v57 = vmul.f32 0.5, %v241_v50  ;;  %v243_v5 = vadd.f32 1.0, %v458_v1 }
  0xe2   :  { %v272_v39 = vmul.f32 %v256_v36, %v118_v0  ;;  %v258_v58 = vmul.f32 0.5, %v242_v51  ;;  %v182_v0 = vmul.f32 0.044715, %v166_v60  ;;  %v460_v2 = vpop.eup %459 }
  0xe3   :  { %v273_v61 = vmul.f32 %v257_v57, %v577_v53  ;;  %v244_v6 = vadd.f32 1.0, %v460_v2  ;;  %v259_v9 = vmul.f32 0.5, %v243_v5  ;;  %v462_v11 = vpop.eup %461 }
  0xe4   :  { %v283_v43 = vpack.c.bf16 %v272_v39, %v271_v38  ;;  %v274_v62 = vmul.f32 %v258_v58, %v581_v56  ;;  %v198_v4 = vadd.f32 %v182_v0, %v133_v48  ;;  %v245_v14 = vadd.f32 1.0, %v462_v11 }
  0xe5   :  { %v260_v10 = vmul.f32 0.5, %v244_v6  ;;  %v275_v53 = vmul.f32 %v259_v9, %v592_v20 }
  0xe6   :  { %421 = vmatmul.msk.bf16.vlgmr.msra.gmra.mxu2 %vm303_vm1, %v283_v43  ;;  %v284_v26 = vpack.c.bf16 %v274_v62, %v273_v61  ;;  %v214_v8 = vmul.f32 0.7978846, %v198_v4  ;;  %v261_v16 = vmul.f32 0.5, %v245_v14 }
  0xe7   :  { %v276_v56 = vmul.f32 %v260_v10, %v128_v23 }
  0xe8   :  { %463 = vtanh.f32 %v214_v8  ;;  %v277_v18 = vmul.f32 %v261_v16, %v131_v46 }
  0xe9   :  { %v285_v12 = vpack.c.bf16 %v276_v56, %v275_v53 }
  0xee   :  { %v464_v13 = vpop.eup %463 }
  0xef   :  { %v246_v15 = vadd.f32 1.0, %v464_v13 }
  0xf1   :  { %v262_v17 = vmul.f32 0.5, %v246_v15 }
  0xf3   :  { %v278_v19 = vmul.f32 %v262_v17, %v133_v48 }
  0xf5   :  { %v286_v21 = vpack.c.bf16 %v278_v19, %v277_v18 }
  0xf6   :  { %422 = vmatmul.msk.bf16.gmra.mxu2 %vm303_vm1, %v284_v26 }
 0x106   :  { %423 = vmatmul.msk.bf16.gmra.mxu2 %vm303_vm1, %v285_v12 }
 0x116   :  { %424 = vmatmul.msk.bf16.gmra.mxu2 %vm303_vm1, %v286_v21 }
 0x123   :  { %v337_v20 = vpop.f32.mrf.mxu1 }
 0x124   :  { %v338_v23 = vadd.f32 %v432_v22, %v337_v20 }
 0x126   :  { %377 = vst.msk [vmem:[%s682_s5] sm:$0xff] %vm61_vm0, %v338_v23 }
 0x12b   :  { %v339_v25 = vpop.f32.mrf.mxu1 }
 0x12c   :  { %v340_v24 = vadd.f32 %v432_v22, %v339_v25 }
 0x12e   :  { %378 = vst.msk [vmem:[%s682_s5 + $0x8] sm:$0xff] %vm61_vm0, %v340_v24 }
 0x133   :  { %v342_v27 = vpop.f32.mrf.mxu1 }
 0x134   :  { %v343_v28 = vadd.f32 %v432_v22, %v342_v27 }
 0x136   :  { %379 = vst.msk [vmem:[%s682_s5 + $0x10] sm:$0xff] %vm61_vm0, %v343_v28 }
 0x13b   :  { %v344_v29 = vpop.f32.mrf.mxu1 }
 0x13c   :  { %v345_v30 = vadd.f32 %v432_v22, %v344_v29 }
 0x13e   :  { %380 = vst.msk [vmem:[%s682_s5 + $0x18] sm:$0xff] %vm61_vm0, %v345_v30 }
 0x143   :  { %v347_v31 = vpop.f32.mrf.mxu1 }
 0x144   :  { %v348_v32 = vadd.f32 %v432_v22, %v347_v31 }
 0x146   :  { %381 = vst.msk [vmem:[%s682_s5 + $0x20] sm:$0xff] %vm61_vm0, %v348_v32 }
 0x14b   :  { %v349_v33 = vpop.f32.mrf.mxu1 }
 0x14c   :  { %v350_v34 = vadd.f32 %v432_v22, %v349_v33 }
 0x14e   :  { %382 = vst.msk [vmem:[%s682_s5 + $0x28] sm:$0xff] %vm61_vm0, %v350_v34 }
 0x153   :  { %v352_v35 = vpop.f32.mrf.mxu1 }
 0x154   :  { %v353_v36 = vadd.f32 %v432_v22, %v352_v35 }
 0x156   :  { %383 = vst.msk [vmem:[%s682_s5 + $0x30] sm:$0xff] %vm61_vm0, %v353_v36 }
 0x15b   :  { %v354_v37 = vpop.f32.mrf.mxu1 }
 0x15c   :  { %v355_v38 = vadd.f32 %v432_v22, %v354_v37 }
 0x15e   :  { %384 = vst.msk [vmem:[%s682_s5 + $0x38] sm:$0xff] %vm61_vm0, %v355_v38 }
 0x169   :  { %v357_v39 = vpop.f32.mrf.mxu2 }
 0x16a   :  { %v358_v40 = vadd.f32 %v432_v22, %v357_v39 }
 0x16c   :  { %385 = vst.msk [vmem:[%s682_s5 + $0x40] sm:$0xff] %vm61_vm0, %v358_v40 }
 0x171   :  { %v359_v41 = vpop.f32.mrf.mxu2 }
 0x172   :  { %v360_v42 = vadd.f32 %v432_v22, %v359_v41 }
 0x174   :  { %386 = vst.msk [vmem:[%s682_s5 + $0x48] sm:$0xff] %vm61_vm0, %v360_v42 }
 0x179   :  { %v362_v43 = vpop.f32.mrf.mxu2 }
 0x17a   :  { %v363_v44 = vadd.f32 %v432_v22, %v362_v43 }
 0x17c   :  { %387 = vst.msk [vmem:[%s682_s5 + $0x50] sm:$0xff] %vm61_vm0, %v363_v44 }
 0x181   :  { %v364_v45 = vpop.f32.mrf.mxu2 }
 0x182   :  { %v365_v46 = vadd.f32 %v432_v22, %v364_v45 }
 0x184   :  { %388 = vst.msk [vmem:[%s682_s5 + $0x58] sm:$0xff] %vm61_vm0, %v365_v46 }
 0x189   :  { %v367_v47 = vpop.f32.mrf.mxu2 }
 0x18a   :  { %v368_v48 = vadd.f32 %v432_v22, %v367_v47 }
 0x18c   :  { %389 = vst.msk [vmem:[%s682_s5 + $0x60] sm:$0xff] %vm61_vm0, %v368_v48 }
 0x191   :  { %v369_v50 = vpop.f32.mrf.mxu2 }
 0x192   :  { %v370_v51 = vadd.f32 %v432_v22, %v369_v50 }
 0x194   :  { %390 = vst.msk [vmem:[%s682_s5 + $0x68] sm:$0xff] %vm61_vm0, %v370_v51 }
 0x199   :  { %v372_v52 = vpop.f32.mrf.mxu2 }
 0x19a   :  { %v373_v54 = vadd.f32 %v432_v22, %v372_v52 }
 0x19c   :  { %391 = vst.msk [vmem:[%s682_s5 + $0x70] sm:$0xff] %vm61_vm0, %v373_v54 }
 0x1a1   :  { %v374_v49 = vpop.f32.mrf.mxu2 }
 0x1a2   :  { %v375_v55 = vadd.f32 %v432_v22, %v374_v49 }
 0x1a4   :  { %392 = vst.msk [vmem:[%s682_s5 + $0x78] sm:$0xff] %vm61_vm0, %v375_v55 }

</bundles_post_ra>
